<compile_context>
chip_gen: v5e
topology: v5e:2x2
jax: 0.10.0
libtpu: 0.0.40
codegen_flags: <defaults>
</compile_context>

<pallas_src>
import functools

import jax
import jax.numpy as jnp
from jax.experimental import pallas as pl
from jax.experimental.pallas import tpu as pltpu


def _round_up(x: int, m: int) -> int:
    return ((x + m - 1) // m) * m


def _c_avg_embedder_kernel(x_ref, w1_ref, b1_ref, w2_ref, b2_ref, out_ref,
                           *, compute_dtype):
    """One batch tile of the MLP forward.

    x_ref:  (TB, C_IN)    f32
    w1_ref: (C_IN, H)     f32
    b1_ref: (1, H)        f32
    w2_ref: (H, H_OUT)    f32
    b2_ref: (1, H_OUT)    f32
    out_ref:(TB, H_OUT)   f32
    """
    # MXU matmuls in compute_dtype (bf16 by default) with f32 accumulation.
    x = x_ref[...].astype(compute_dtype)
    w1 = w1_ref[...].astype(compute_dtype)
    w2 = w2_ref[...].astype(compute_dtype)

    h = jnp.dot(x, w1, preferred_element_type=jnp.float32) + b1_ref[...]
    h = h * jax.nn.sigmoid(h)  # SiLU in f32 on the VPU/EUP.
    out = jnp.dot(h.astype(compute_dtype), w2,
                  preferred_element_type=jnp.float32) + b2_ref[...]

    out_ref[...] = out.astype(out_ref.dtype)


def _choose_batch_tile(B: int, block_b: int) -> int:
    """Batch tile: multiple of 8, capped at block_b; for big batches use
    256-multiples (fills the 2x256 MXU rows) and make sure there are >=2 tiles
    so the second v7x TensorCore participates."""
    block_b = max(8, _round_up(block_b, 8))
    tb = min(block_b, _round_up(B, 8))
    if B >= 512:
        tb = min(tb, _round_up(pl.cdiv(B, 2), 256))
    return tb


def c_avg_embedder(x, w1, b1, w2, b2, *, block_b: int = 1024,
                   compute_dtype=jnp.bfloat16):
    """x: (B, in_channels).  Returns (B, out_channels).

    Weights: w1 (in_channels, out_channels), w2 (out_channels, out_channels),
    biases b1/b2 (out_channels,).  Stored f32; matmul operands cast to
    `compute_dtype` in-kernel (accumulation always f32).
    """
    B, c_in = x.shape
    hidden = w1.shape[1]
    out_dim = w2.shape[1]

    # Guard the (in, out) transposed-weight convention (silent mismatch vs
    # PyTorch's (out, in) layout would be wrong, not an error).
    assert w1.shape == (c_in, hidden), (w1.shape, (c_in, hidden))
    assert w2.shape == (hidden, out_dim), (w2.shape, (hidden, out_dim))
    assert b1.shape == (hidden,), b1.shape
    assert b2.shape == (out_dim,), b2.shape

    b1_2d = b1.reshape(1, hidden)
    b2_2d = b2.reshape(1, out_dim)

    kernel = functools.partial(_c_avg_embedder_kernel,
                               compute_dtype=compute_dtype)

    cost = pl.CostEstimate(
        flops=2 * B * (c_in * hidden + hidden * out_dim),
        transcendentals=B * hidden,  # sigmoid
        bytes_accessed=4 * (B * c_in + c_in * hidden + hidden
                            + hidden * out_dim + out_dim + B * out_dim),
    )

    tb = _choose_batch_tile(B, block_b)
    num_tiles = pl.cdiv(B, tb)

    if num_tiles == 1:
        # Tiny-batch fast path: no grid, no pipeline setup -- whole arrays as
        # single VMEM blocks.
        return pl.pallas_call(
            kernel,
            out_shape=jax.ShapeDtypeStruct((B, out_dim), x.dtype),
            cost_estimate=cost,
        )(x, w1, b1_2d, w2, b2_2d)

    # Batch-tiled path. Partial edge block (B % tb != 0) is masked by Pallas:
    # garbage rows in the padded input block only affect their own (unwritten)
    # output rows since the matmul is row-independent.
    return pl.pallas_call(
        kernel,
        out_shape=jax.ShapeDtypeStruct((B, out_dim), x.dtype),
        grid=(num_tiles,),
        in_specs=[
            # Batch-tiled activations.
            pl.BlockSpec((tb, c_in), lambda i: (i, 0)),
            # Weights / biases at a constant block index -> VMEM resident
            # across all batch tiles.  If c_in/hidden ever grow large enough
            # to pressure v7x's 64 MiB VMEM, tile the hidden dim instead of
            # holding w1/w2 whole.
            pl.BlockSpec((c_in, hidden), lambda i: (0, 0)),
            pl.BlockSpec((1, hidden), lambda i: (0, 0)),
            pl.BlockSpec((hidden, out_dim), lambda i: (0, 0)),
            pl.BlockSpec((1, out_dim), lambda i: (0, 0)),
        ],
        out_specs=pl.BlockSpec((tb, out_dim), lambda i: (i, 0)),
        compiler_params=pltpu.CompilerParams(
            # Batch tiles are independent -> shard across TCs on v7x megacore.
            dimension_semantics=("parallel",)
        ),
        cost_estimate=cost,
    )(x, w1, b1_2d, w2, b2_2d)


def _reference(x, w1, b1, w2, b2):
    """Pure-JAX reference mirroring the PyTorch module (full f32 precision)."""
    p = jax.lax.Precision.HIGHEST
    h = jnp.dot(x, w1, precision=p) + b1
    h = h * jax.nn.sigmoid(h)
    return jnp.dot(h, w2, precision=p) + b2


if __name__ == "__main__":
    key = jax.random.PRNGKey(0)
    k_x, k_w1, k_b1, k_w2, k_b2, k_x2 = jax.random.split(key, 6)

    B = 12              # realistic tiny batch -> exercises the no-grid path
    IN_CHANNELS = 256   # lane-dense contraction dim
    OUT_CHANNELS = 128  # lane-dense output -> unmasked vst

    x = jax.random.normal(k_x, (B, IN_CHANNELS), dtype=jnp.float32)

    # Linear weights stored as (in, out); biases as (out,).
    w1 = jax.random.normal(k_w1, (IN_CHANNELS, OUT_CHANNELS), dtype=jnp.float32) * 0.02
    b1 = jax.random.normal(k_b1, (OUT_CHANNELS,), dtype=jnp.float32) * 0.02
    w2 = jax.random.normal(k_w2, (OUT_CHANNELS, OUT_CHANNELS), dtype=jnp.float32) * 0.02
    b2 = jax.random.normal(k_b2, (OUT_CHANNELS,), dtype=jnp.float32) * 0.02

    ref = _reference(x, w1, b1, w2, b2)

    # 1) Exact f32 path (no-grid, single-tile batch).
    out_f32 = jax.block_until_ready(
        c_avg_embedder(x, w1, b1, w2, b2, compute_dtype=jnp.float32))
    assert out_f32.shape == (B, OUT_CHANNELS), out_f32.shape
    assert jnp.allclose(out_f32, ref, atol=1e-3, rtol=1e-3), "f32 mismatch vs reference"

    # 2) Default bf16-MXU path (f32 accumulation) -- small, expected drift.
    out_bf16 = jax.block_until_ready(c_avg_embedder(x, w1, b1, w2, b2))
    assert jnp.allclose(out_bf16, ref, atol=3e-2, rtol=3e-2), "bf16 mismatch vs reference"

    # 3) Multi-tile grid path with a masked partial edge block (B=20, tb=8).
    B2 = 20
    x2 = jax.random.normal(k_x2, (B2, IN_CHANNELS), dtype=jnp.float32)
    ref2 = _reference(x2, w1, b1, w2, b2)
    out2 = jax.block_until_ready(
        c_avg_embedder(x2, w1, b1, w2, b2, block_b=8, compute_dtype=jnp.float32))
    assert out2.shape == (B2, OUT_CHANNELS), out2.shape
    assert jnp.allclose(out2, ref2, atol=1e-3, rtol=1e-3), "tiled mismatch vs reference"

    print("KERNEL_OK")
</pallas_src>

<mosaic_0001>
module attributes {stable_mosaic.version = 11 : i64} {
  func.func @_c_avg_embedder_kernel(%arg0: memref<12x256xf32, #tpu.memory_space<vmem>>, %arg1: memref<256x128xf32, #tpu.memory_space<vmem>>, %arg2: memref<1x128xf32, #tpu.memory_space<vmem>>, %arg3: memref<128x128xf32, #tpu.memory_space<vmem>>, %arg4: memref<1x128xf32, #tpu.memory_space<vmem>>, %arg5: memref<12x128xf32, #tpu.memory_space<vmem>>) attributes {dimension_semantics = [], scalar_prefetch = 0 : i64, scratch_operands = 0 : i64, tpu.core_type = #tpu.core_type<tc>} {
    %c0 = arith.constant 0 : index
    %c0_0 = arith.constant 0 : index
    %0 = vector.load %arg0[%c0, %c0_0] : memref<12x256xf32, #tpu.memory_space<vmem>>, vector<12x256xf32>
    %c0_1 = arith.constant 0 : index
    %c0_2 = arith.constant 0 : index
    %1 = vector.load %arg1[%c0_1, %c0_2] : memref<256x128xf32, #tpu.memory_space<vmem>>, vector<256x128xf32>
    %c0_3 = arith.constant 0 : index
    %c0_4 = arith.constant 0 : index
    %2 = vector.load %arg3[%c0_3, %c0_4] : memref<128x128xf32, #tpu.memory_space<vmem>>, vector<128x128xf32>
    %cst = arith.constant dense<0.000000e+00> : vector<12x128xf32>
    %3 = tpu.matmul %0, %1, %cst {dimension_numbers = #tpu.dot_dimension_numbers<[1], [0], [0], [1], [0, 0, 1, 1], [], []>} : vector<12x256xf32>, vector<256x128xf32>, vector<12x128xf32> -> vector<12x128xf32>
    %c0_5 = arith.constant 0 : index
    %c0_6 = arith.constant 0 : index
    %4 = vector.load %arg2[%c0_5, %c0_6] : memref<1x128xf32, #tpu.memory_space<vmem>>, vector<1x128xf32>
    %5 = vector.broadcast %4 : vector<1x128xf32> to vector<12x128xf32>
    %6 = arith.addf %3, %5 : vector<12x128xf32>
    %7 = arith.negf %6 : vector<12x128xf32>
    %8 = math.exp %7 : vector<12x128xf32>
    %cst_7 = arith.constant 1.000000e+00 : f32
    %9 = vector.broadcast %cst_7 : f32 to vector<12x128xf32>
    %10 = arith.addf %9, %8 : vector<12x128xf32>
    %11 = arith.divf %9, %10 : vector<12x128xf32>
    %12 = arith.mulf %6, %11 : vector<12x128xf32>
    %cst_8 = arith.constant dense<0.000000e+00> : vector<12x128xf32>
    %13 = tpu.matmul %12, %2, %cst_8 {dimension_numbers = #tpu.dot_dimension_numbers<[1], [0], [0], [1], [0, 0, 1, 1], [], []>} : vector<12x128xf32>, vector<128x128xf32>, vector<12x128xf32> -> vector<12x128xf32>
    %c0_9 = arith.constant 0 : index
    %c0_10 = arith.constant 0 : index
    %14 = vector.load %arg4[%c0_9, %c0_10] : memref<1x128xf32, #tpu.memory_space<vmem>>, vector<1x128xf32>
    %15 = vector.broadcast %14 : vector<1x128xf32> to vector<12x128xf32>
    %16 = arith.addf %13, %15 : vector<12x128xf32>
    %c0_11 = arith.constant 0 : index
    %c0_12 = arith.constant 0 : index
    %17 = vector.load %arg5[%c0_11, %c0_12] : memref<12x128xf32, #tpu.memory_space<vmem>>, vector<12x128xf32>
    tpu.vector_store %arg5[%c0_11, %c0_12], %16 {strides = array<i32>} : memref<12x128xf32, #tpu.memory_space<vmem>>, vector<12x128xf32>,
    return
  }
}

</mosaic_0001>

<bundles_post_ra>
// kernel: tpu_custom_call.1
= control target key start
LH: loop header
LB: loop body
LE: loop exit
PB: predicated region body
PF: predicated region fallthrough
CT: control target
= control target key end

     0   :  { %10 = vsyncpa [#allocation3], 0  ;;  %s462_s0 = inlined_call_operand.hbm [shape: f32[12,256], index: 0, kind: input, shape index: {}]   ;;  %s463_s1 = inlined_call_operand.hbm [shape: f32[256,128], index: 1, kind: input, shape index: {}]   ;;  %s464_s2 = inlined_call_operand.vmem [shape: f32[1,128], index: 2, kind: input, shape index: {}]   ;;  %s465_s3 = inlined_call_operand.hbm [shape: f32[128,128], index: 3, kind: input, shape index: {}]   ;;  %s466_s4 = inlined_call_operand.vmem [shape: f32[1,128], index: 4, kind: input, shape index: {}]   ;;  %s467_s5 = inlined_call_operand.hbm [shape: f32[12,128], index: 5, kind: output, shape index: {}]  }
   0x1   :  { %11 = vsyncpa [#allocation6], 0  ;;  %s30_s20 = sshll.u32 %s463_s1, 4  ;;  %s31_s20 = int_to_ptr.hbm [resolvable:$true] %s30_s20 }
   0x2   :  { %12 = vsyncpa [#allocation4], 0  ;;  %s397_s21 = smov [#allocation5]   ;;  %s17_s25 = sshll.u32 %s462_s0, 4  ;;  %s18_s25 = int_to_ptr.hbm [resolvable:$true] %s17_s25 }
   0x3   :  { %s32_s22 = sshll.u32 %s397_s21, 4  ;;  %s398_s26 = smov 128   ;;  %s33_s22 = int_to_ptr.vmem [resolvable:$true] %s32_s22 }
   0x4   :  { %s399_s27 = smov 8   ;;  %s400_s28 = smov [#allocation2]  }
   0x5   :  { %38 = dma.hbm_to_vmem [thread:$0]  %s31_s20, 4096, %s33_s22, [#allocation6], %s398_s26, %s398_s26, %s399_s27  }
   0x6   :  { %s19_s29 = sshll.u32 %s400_s28, 4  ;;  %s401_s1 = smov 256   ;;  %s20_s29 = int_to_ptr.vmem [resolvable:$true] %s19_s29 }
   0x7   :  { %s402_s30 = smov 16   ;;  %s45_s8 = sshll.u32 %s465_s3, 4  ;;  %s46_s8 = int_to_ptr.hbm [resolvable:$true] %s45_s8 }
   0x8   :  { %25 = dma.hbm_to_vmem [thread:$0]  %s18_s25, 512, %s20_s29, [#allocation3], %s401_s1, %s401_s1, %s402_s30  }
   0x9   :  { %s403_s9 = smov [#allocation7]  }
   0xa   :  { %s47_s0 = sshll.u32 %s403_s9, 4  ;;  %s48_s0 = int_to_ptr.vmem [resolvable:$true] %s47_s0 }
   0xb   :  { %53 = dma.hbm_to_vmem [thread:$0]  %s46_s8, 2048, %s48_s0, [#allocation6], %s398_s26, %s398_s26, %s399_s27  }
   0xc   :  { %391 = dma.done.wait [#allocation3], 512  }
   0xd   :  { %392 = vsyncadd [#allocation3], 4294966784 }
   0xe   :  { %393 = dma.done.wait [#allocation6], 6144  }
   0xf   :  { %394 = vsyncadd [#allocation6], 4294961152  ;;  %v87_v0 = vld [vmem:[#allocation5 + $0x78] sm:$0xff]  ;;  %v86_v2 = vld [vmem:[#allocation5 + $0x70] sm:$0xff]  ;;  %s404_s12 = smov [#allocation8]   ;;  %s245_s16 = sshll.u32 %s467_s5, 4  ;;  %s246_s16 = int_to_ptr.hbm [resolvable:$true] %s245_s16 }
  0x10   :  { %v103_v1 = vld [vmem:[#allocation5 + $0xf8] sm:$0xff]  ;;  %124 = vmatpush.msra.mxu0 %v87_v0  ;;  %261 = vmatpush.msra.mxu3 %v87_v0  ;;  %v102_v3 = vld [vmem:[#allocation5 + $0xf0] sm:$0xff]  ;;  %v85_v4 = vld [vmem:[#allocation5 + $0x68] sm:$0xff]  ;;  %s243_s13 = sshll.u32 %s404_s12, 4  ;;  %s244_s13 = int_to_ptr.vmem [resolvable:$true] %s243_s13 }
  0x11   :  { %147 = vmatpush.msra.mxu1 %v103_v1  ;;  %v101_v5 = vld [vmem:[#allocation5 + $0xe8] sm:$0xff]  ;;  %v84_v6 = vld [vmem:[#allocation5 + $0x60] sm:$0xff]  ;;  %v83_v8 = vld [vmem:[#allocation5 + $0x58] sm:$0xff] }
  0x12   :  { %125 = vmatpush.msra.mxu0 %v86_v2  ;;  %262 = vmatpush.msra.mxu3 %v86_v2  ;;  %v100_v7 = vld [vmem:[#allocation5 + $0xe0] sm:$0xff]  ;;  %v99_v9 = vld [vmem:[#allocation5 + $0xd8] sm:$0xff]  ;;  %v82_v10 = vld [vmem:[#allocation5 + $0x50] sm:$0xff] }
  0x13   :  { %148 = vmatpush.msra.mxu1 %v102_v3  ;;  %v98_v11 = vld [vmem:[#allocation5 + $0xd0] sm:$0xff]  ;;  %v81_v12 = vld [vmem:[#allocation5 + $0x48] sm:$0xff]  ;;  %v80_v14 = vld [vmem:[#allocation5 + $0x40] sm:$0xff] }
  0x14   :  { %126 = vmatpush.msra.mxu0 %v85_v4  ;;  %263 = vmatpush.msra.mxu3 %v85_v4  ;;  %v97_v13 = vld [vmem:[#allocation5 + $0xc8] sm:$0xff]  ;;  %v96_v15 = vld [vmem:[#allocation5 + $0xc0] sm:$0xff]  ;;  %v79_v16 = vld [vmem:[#allocation5 + $0x38] sm:$0xff] }
  0x15   :  { %149 = vmatpush.msra.mxu1 %v101_v5  ;;  %v95_v17 = vld [vmem:[#allocation5 + $0xb8] sm:$0xff]  ;;  %v78_v18 = vld [vmem:[#allocation5 + $0x30] sm:$0xff]  ;;  %v77_v20 = vld [vmem:[#allocation5 + $0x28] sm:$0xff] }
  0x16   :  { %127 = vmatpush.msra.mxu0 %v84_v6  ;;  %264 = vmatpush.msra.mxu3 %v84_v6  ;;  %v94_v19 = vld [vmem:[#allocation5 + $0xb0] sm:$0xff]  ;;  %v93_v21 = vld [vmem:[#allocation5 + $0xa8] sm:$0xff]  ;;  %v76_v22 = vld [vmem:[#allocation5 + $0x20] sm:$0xff] }
  0x17   :  { %150 = vmatpush.msra.mxu1 %v100_v7  ;;  %v92_v23 = vld [vmem:[#allocation5 + $0xa0] sm:$0xff]  ;;  %v75_v24 = vld [vmem:[#allocation5 + $0x18] sm:$0xff]  ;;  %v74_v26 = vld [vmem:[#allocation5 + $0x10] sm:$0xff] }
  0x18   :  { %128 = vmatpush.msra.mxu0 %v83_v8  ;;  %265 = vmatpush.msra.mxu3 %v83_v8  ;;  %v91_v25 = vld [vmem:[#allocation5 + $0x98] sm:$0xff]  ;;  %v90_v27 = vld [vmem:[#allocation5 + $0x90] sm:$0xff]  ;;  %v73_v28 = vld [vmem:[#allocation5 + $0x8] sm:$0xff] }
  0x19   :  { %151 = vmatpush.msra.mxu1 %v99_v9  ;;  %v89_v29 = vld [vmem:[#allocation5 + $0x88] sm:$0xff]  ;;  %v72_v30 = vld [vmem:[#allocation5] sm:$0xff]  ;;  %v70_v33 = vld [vmem:[#allocation2 + $0x10] sm:$0xf] }
  0x1a   :  { %129 = vmatpush.msra.mxu0 %v82_v10  ;;  %266 = vmatpush.msra.mxu3 %v82_v10  ;;  %v88_v31 = vld [vmem:[#allocation5 + $0x80] sm:$0xff]  ;;  %v69_v34 = vld [vmem:[#allocation2 + $0x8] sm:$0xff]  ;;  %v71_v35 = vld [vmem:[#allocation2 + $0x18] sm:$0xf] }
  0x1b   :  { %152 = vmatpush.msra.mxu1 %v98_v11  ;;  %v68_v32 = vld [vmem:[#allocation2] sm:$0xff]  ;;  %v119_v36 = vld [vmem:[#allocation7 + $0x78] sm:$0xff]  ;;  %v118_v37 = vld [vmem:[#allocation7 + $0x70] sm:$0xff] }
  0x1c   :  { %130 = vmatpush.msra.mxu0 %v81_v12  ;;  %267 = vmatpush.msra.mxu3 %v81_v12  ;;  %v117_v38 = vld [vmem:[#allocation7 + $0x68] sm:$0xff]  ;;  %v116_v39 = vld [vmem:[#allocation7 + $0x60] sm:$0xff]  ;;  %v115_v40 = vld [vmem:[#allocation7 + $0x58] sm:$0xff] }
  0x1d   :  { %153 = vmatpush.msra.mxu1 %v97_v13  ;;  %214 = vmatpush.msra.mxu2 %v119_v36  ;;  %v114_v41 = vld [vmem:[#allocation7 + $0x50] sm:$0xff]  ;;  %v113_v42 = vld [vmem:[#allocation7 + $0x48] sm:$0xff]  ;;  %v112_v43 = vld [vmem:[#allocation7 + $0x40] sm:$0xff] }
  0x1e   :  { %131 = vmatpush.msra.mxu0 %v80_v14  ;;  %268 = vmatpush.msra.mxu3 %v80_v14  ;;  %v111_v44 = vld [vmem:[#allocation7 + $0x38] sm:$0xff]  ;;  %v110_v45 = vld [vmem:[#allocation7 + $0x30] sm:$0xff]  ;;  %v109_v46 = vld [vmem:[#allocation7 + $0x28] sm:$0xff] }
  0x1f   :  { %154 = vmatpush.msra.mxu1 %v96_v15  ;;  %215 = vmatpush.msra.mxu2 %v118_v37  ;;  %v108_v47 = vld [vmem:[#allocation7 + $0x20] sm:$0xff]  ;;  %v107_v48 = vld [vmem:[#allocation7 + $0x18] sm:$0xff]  ;;  %v106_v49 = vld [vmem:[#allocation7 + $0x10] sm:$0xff] }
  0x20   :  { %132 = vmatpush.msra.mxu0 %v79_v16  ;;  %269 = vmatpush.msra.mxu3 %v79_v16  ;;  %v285_v50 = vld [vmem:[%s464_s2] ss:$0 sm:$0xff]  ;;  %v105_v51 = vld [vmem:[#allocation7 + $0x8] sm:$0xff] }
  0x21   :  { %155 = vmatpush.msra.mxu1 %v95_v17  ;;  %216 = vmatpush.msra.mxu2 %v117_v38  ;;  %v104_v53 = vld [vmem:[#allocation7] sm:$0xff] }
  0x22   :  { %133 = vmatpush.msra.mxu0 %v78_v18  ;;  %270 = vmatpush.msra.mxu3 %v78_v18 }
  0x23   :  { %156 = vmatpush.msra.mxu1 %v94_v19  ;;  %217 = vmatpush.msra.mxu2 %v116_v39 }
  0x24   :  { %134 = vmatpush.msra.mxu0 %v77_v20  ;;  %271 = vmatpush.msra.mxu3 %v77_v20 }
  0x25   :  { %157 = vmatpush.msra.mxu1 %v93_v21  ;;  %218 = vmatpush.msra.mxu2 %v115_v40 }
  0x26   :  { %135 = vmatpush.msra.mxu0 %v76_v22  ;;  %272 = vmatpush.msra.mxu3 %v76_v22 }
  0x27   :  { %158 = vmatpush.msra.mxu1 %v92_v23  ;;  %219 = vmatpush.msra.mxu2 %v114_v41 }
  0x28   :  { %136 = vmatpush.msra.mxu0 %v75_v24  ;;  %273 = vmatpush.msra.mxu3 %v75_v24 }
  0x29   :  { %159 = vmatpush.msra.mxu1 %v91_v25  ;;  %220 = vmatpush.msra.mxu2 %v113_v42  ;;  %v286_v25 = vld [vmem:[%s466_s4] ss:$0 sm:$0xff] }
  0x2a   :  { %137 = vmatpush.msra.mxu0 %v74_v26  ;;  %274 = vmatpush.msra.mxu3 %v74_v26 }
  0x2b   :  { %160 = vmatpush.msra.mxu1 %v90_v27  ;;  %221 = vmatpush.msra.mxu2 %v112_v43 }
  0x2c   :  { %138 = vmatpush.msra.mxu0 %v73_v28  ;;  %275 = vmatpush.msra.mxu3 %v73_v28 }
  0x2d   :  { %161 = vmatpush.msra.mxu1 %v89_v29  ;;  %222 = vmatpush.msra.mxu2 %v111_v44 }
  0x2e   :  { %139 = vmatpush.msra.mxu0 %v72_v30  ;;  %276 = vmatpush.msra.mxu3 %v72_v30 }
  0x2f   :  { %162 = vmatpush.msra.mxu1 %v88_v31  ;;  %140 = vmatmul.f32.vlgmr.msra.gmra.mxu0 %v68_v32 }
  0x30   :  { %143 = vmatmul.f32.vlgmr.msra.gmra.mxu3 %v70_v33  ;;  %163 = vmatmul.f32.vlgmr.msra.gmra.mxu1 %v69_v34 }
  0x31   :  { %223 = vmatpush.msra.mxu2 %v110_v45 }
  0x33   :  { %224 = vmatpush.msra.mxu2 %v109_v46 }
  0x35   :  { %225 = vmatpush.msra.mxu2 %v108_v47 }
  0x37   :  { %226 = vmatpush.msra.mxu2 %v107_v48 }
  0x38   :  { %166 = vmatmul.f32.gmra.mxu1 %v71_v35 }
  0x39   :  { %227 = vmatpush.msra.mxu2 %v106_v49 }
  0x3b   :  { %228 = vmatpush.msra.mxu2 %v105_v51 }
  0x3d   :  { %229 = vmatpush.msra.mxu2 %v104_v53 }
  0xac   :  { %v141_v52 = vpop.f32.mrf.mxu0 }
  0xad   :  { %v142_v54 = vadd.f32 %v285_v50, %v141_v52  ;;  %v164_v55 = vpop.f32.mrf.mxu1 }
  0xaf   :  { %v165_v56 = vadd.f32 %v164_v55, %v142_v54 }
  0xb1   :  { %v259_v57 = vmul.f32 -1.442695, %v165_v56 }
  0xb3   :  { %287 = vpow2.f32 %v259_v57  ;;  %v144_v58 = vpop.f32.mrf.mxu3 }
  0xb4   :  { %v145_v59 = vadd.f32 %v285_v50, %v144_v58 }
  0xb5   :  { %v167_v60 = vpop.f32.mrf.mxu1 }
  0xb6   :  { %v168_v61 = vadd.f32 %v167_v60, %v145_v59 }
  0xb8   :  { %v260_v62 = vmul.f32 -1.442695, %v168_v61 }
  0xb9   :  { %v288_v63 = vpop.eup %287 }
  0xba   :  { %v176_v0 = vadd.f32 1.0, %v288_v63  ;;  %289 = vpow2.f32 %v260_v62 }
  0xbc   :  { %291 = vrcp.f32 %v176_v0  ;;  %v189_v6 = vand.u32 2147483648, %v176_v0  ;;  %v187_v8 = vand.u32 2147483647, %v176_v0  ;;  %vm183_vm1 = vweird.f32 %v176_v0 }
  0xbe   :  { %v190_v11 = vor.u32 1.1754944e-38, %v189_v6  ;;  %vm188_vm3 = vcmp.eq.f32.partialorder %v187_v8, 8.507059e+37 }
  0xc0   :  { %v290_v1 = vpop.eup %289 }
  0xc1   :  { %v177_v2 = vadd.f32 1.0, %v290_v1 }
  0xc2   :  { %v292_v3 = vpop.eup %291 }
  0xc3   :  { %293 = vrcp.f32 %v177_v2  ;;  %v179_v4 = vmul.f32 %v292_v3, %v176_v0  ;;  %vm184_vm0 = vweird.f32 %v292_v3  ;;  %v204_v17 = vand.u32 2147483648, %v177_v2 }
  0xc4   :  { %vm185_vm2 = vmor %vm183_vm1, %vm184_vm0  ;;  %v202_v19 = vand.u32 2147483647, %v177_v2  ;;  %vm198_vm5 = vweird.f32 %v177_v2 }
  0xc5   :  { %v180_v5 = vsub.f32 1.0, %v179_v4  ;;  %v205_v21 = vor.u32 1.1754944e-38, %v204_v17 }
  0xc6   :  { %vm203_vm7 = vcmp.eq.f32.partialorder %v202_v19, 8.507059e+37 }
  0xc7   :  { %v181_v7 = vmul.f32 %v292_v3, %v180_v5 }
  0xc9   :  { %v294_v9 = vpop.eup %293  ;;  %v182_v10 = vadd.f32 %v292_v3, %v181_v7 }
  0xca   :  { %v194_v12 = vmul.f32 %v294_v9, %v177_v2  ;;  %vm199_vm4 = vweird.f32 %v294_v9 }
  0xcb   :  { %v186_v13 = vsel %vm185_vm2, %v292_v3, %v182_v10  ;;  %vm200_vm6 = vmor %vm198_vm5, %vm199_vm4 }
  0xcc   :  { %v191_v14 = vsel %vm188_vm3, %v190_v11, %v186_v13  ;;  %v195_v15 = vsub.f32 1.0, %v194_v12 }
  0xcd   :  { %v208_v16 = vmul.f32 %v191_v14, %v165_v56 }
  0xce   :  { %v196_v18 = vmul.f32 %v294_v9, %v195_v15 }
  0xcf   :  { %230 = vmatmul.f32.vlgmr.msra.gmra.mxu2 %v208_v16 }
  0xd0   :  { %v197_v20 = vadd.f32 %v294_v9, %v196_v18 }
  0xd2   :  { %v201_v22 = vsel %vm200_vm6, %v294_v9, %v197_v20 }
  0xd3   :  { %v206_v23 = vsel %vm203_vm7, %v205_v21, %v201_v22 }
  0xd4   :  { %v209_v24 = vmul.f32 %v206_v23, %v168_v61 }
  0xd7   :  { %233 = vmatmul.f32.gmra.mxu2 %v209_v24 }
 0x152   :  { %v231_v26 = vpop.f32.mrf.mxu2 }
 0x153   :  { %v232_v27 = vadd.f32 %v286_v25, %v231_v26 }
 0x155   :  { %237 = vst [vmem:[#allocation8] sm:$0xff] %v232_v27 }
 0x15a   :  { %v234_v28 = vpop.f32.mrf.mxu2 }
 0x15b   :  { %v235_v29 = vadd.f32 %v286_v25, %v234_v28 }
 0x15d   :  { %238 = vst [vmem:[#allocation8 + $0x8] sm:$0xf] %v235_v29 }
 0x15e   :  { %251 = dma.vmem_to_hbm [thread:$0]  %s244_s13, 256, %s246_s16, [#allocation4], %s398_s26, %s398_s26, %s399_s27  }
 0x15f   :  { %395 = dma.done.wait [#allocation4], 256  }
 0x160   :  { %396 = vsyncadd [#allocation4], 4294967040 }
 0x161   :  { %256 = vsyncpa [#allocation3], 1 }
 0x162   :  { %257 = vsyncpa [#allocation6], 1 }
 0x163   :  { %258 = vsyncpa [#allocation4], 1 }

</bundles_post_ra>
